<compile_context>
chip_gen: v7x
topology: tpu7x:2x2x1
jax: 0.10.0
libtpu: 0.0.40
codegen_flags: <defaults>
</compile_context>

<pallas_src>
import jax
import jax.numpy as jnp
from jax import lax
from jax.experimental import pallas as pl
from jax.experimental.pallas import tpu as pltpu

# ---- problem sizes (small, consistent with the module) ----
N, C_IN, H, W = 2, 4, 16, 16
C_OUT = 8
K = 3          # kernel_size
PAD = 1        # padding
EPS = 1e-5     # BatchNorm2d default eps


def conv_bn_act_kernel(p_ref, w_ref, o_ref):
    """Single invocation (no grid).

    p_ref: (K*K*C_IN + 1, N*H*W)  im2col patches (+ trailing ones row), lane-dense
    w_ref: (C_OUT, K*K*C_IN + 1)  BN-scale-fused conv weights (+ shift column)
    o_ref: (C_OUT, N*H*W)         lane-dense output (512 = 4x128 lanes)
    """
    y = jnp.dot(w_ref[...], p_ref[...], preferred_element_type=jnp.float32)
    o_ref[...] = jnp.tanh(y)


@jax.jit
def conv_bn_activation2d(x_nchw, w_oihw, conv_bias, gamma, beta, run_mean, run_var):
    # --- wrapper glue (plain JAX): padding + im2col + BN folding ---
    x_pad = jnp.pad(x_nchw, ((0, 0), (0, 0), (PAD, PAD), (PAD, PAD)))   # (N, C_in, H+2, W+2)

    # im2col, transposed: row = (kh*K + kw)*C_IN + c_in, col = n*H*W + h*W + w
    taps = [
        jnp.transpose(x_pad[:, :, kh:kh + H, kw:kw + W], (1, 0, 2, 3)).reshape(C_IN, N * H * W)
        for kh in range(K) for kw in range(K)
    ]
    ones_row = jnp.ones((1, N * H * W), jnp.float32)
    patches_t = jnp.concatenate(taps + [ones_row], axis=0)              # (K*K*C_IN+1, N*H*W)

    # Fold eval-mode BN into the conv weights / bias.
    scale = gamma / jnp.sqrt(run_var + EPS)                             # (C_out,)
    shift = beta + (conv_bias - run_mean) * scale                       # (C_out,)
    # (C_out, C_in, KH, KW) -> (C_out, KH, KW, C_in) -> (C_out, K*K*C_in); same row order
    # as the patch rows. Fold scale in, append shift as the column multiplying the ones row.
    w_mat = jnp.transpose(w_oihw, (0, 2, 3, 1)).reshape(C_OUT, K * K * C_IN)
    w_fused = jnp.concatenate([w_mat * scale[:, None], shift[:, None]], axis=1)  # (C_out, KKC+1)

    out_flat = pl.pallas_call(
        conv_bn_act_kernel,
        out_shape=jax.ShapeDtypeStruct((C_OUT, N * H * W), jnp.float32),
        in_specs=[
            pl.BlockSpec(memory_space=pltpu.MemorySpace.VMEM),
            pl.BlockSpec(memory_space=pltpu.MemorySpace.VMEM),
        ],
        out_specs=pl.BlockSpec(memory_space=pltpu.MemorySpace.VMEM),
    )(patches_t.astype(jnp.float32), w_fused.astype(jnp.float32))

    # (C_out, N*H*W) -> (N, C_out, H, W)
    return jnp.transpose(out_flat.reshape(C_OUT, N, H, W), (1, 0, 2, 3))


def reference(x_nchw, w_oihw, conv_bias, gamma, beta, run_mean, run_var):
    y = lax.conv_general_dilated(
        x_nchw, w_oihw,
        window_strides=(1, 1), padding=((PAD, PAD), (PAD, PAD)),
        dimension_numbers=("NCHW", "OIHW", "NCHW"),
    ) + conv_bias.reshape(1, C_OUT, 1, 1)
    y = (y - run_mean.reshape(1, C_OUT, 1, 1)) / jnp.sqrt(run_var.reshape(1, C_OUT, 1, 1) + EPS)
    y = y * gamma.reshape(1, C_OUT, 1, 1) + beta.reshape(1, C_OUT, 1, 1)
    return jnp.tanh(y)


if __name__ == "__main__":
    key = jax.random.PRNGKey(0)
    kx, kw, kb, kg, kbeta, km, kv = jax.random.split(key, 7)

    x = jax.random.normal(kx, (N, C_IN, H, W), dtype=jnp.float32)
    w = jax.random.normal(kw, (C_OUT, C_IN, K, K), dtype=jnp.float32) * 0.1
    conv_bias = jax.random.normal(kb, (C_OUT,), dtype=jnp.float32) * 0.1
    gamma = 1.0 + 0.1 * jax.random.normal(kg, (C_OUT,), dtype=jnp.float32)
    beta = 0.1 * jax.random.normal(kbeta, (C_OUT,), dtype=jnp.float32)
    run_mean = 0.1 * jax.random.normal(km, (C_OUT,), dtype=jnp.float32)
    run_var = jnp.abs(1.0 + 0.1 * jax.random.normal(kv, (C_OUT,), dtype=jnp.float32))

    out = conv_bn_activation2d(x, w, conv_bias, gamma, beta, run_mean, run_var)
    out = jax.block_until_ready(out)

    ref = reference(x, w, conv_bias, gamma, beta, run_mean, run_var)
    assert out.shape == (N, C_OUT, H, W)
    assert jnp.allclose(out, ref, atol=1e-5, rtol=1e-5), float(jnp.max(jnp.abs(out - ref)))

    print("KERNEL_OK")
</pallas_src>

<mosaic_0001>
module attributes {stable_mosaic.version = 11 : i64} {
  func.func @conv_bn_act_kernel(%arg0: memref<37x512xf32, #tpu.memory_space<vmem>>, %arg1: memref<8x37xf32, #tpu.memory_space<vmem>>, %arg2: memref<8x512xf32, #tpu.memory_space<vmem>>) attributes {dimension_semantics = [], scalar_prefetch = 0 : i64, scratch_operands = 0 : i64, tpu.core_type = #tpu.core_type<tc>} {
    %c0 = arith.constant 0 : index
    %c0_0 = arith.constant 0 : index
    %0 = vector.load %arg1[%c0, %c0_0] : memref<8x37xf32, #tpu.memory_space<vmem>>, vector<8x37xf32>
    %c0_1 = arith.constant 0 : index
    %c0_2 = arith.constant 0 : index
    %1 = vector.load %arg0[%c0_1, %c0_2] : memref<37x512xf32, #tpu.memory_space<vmem>>, vector<37x512xf32>
    %cst = arith.constant dense<0.000000e+00> : vector<8x512xf32>
    %2 = tpu.matmul %0, %1, %cst {dimension_numbers = #tpu.dot_dimension_numbers<[1], [0], [0], [1], [0, 0, 1, 1], [], []>} : vector<8x37xf32>, vector<37x512xf32>, vector<8x512xf32> -> vector<8x512xf32>
    %3 = math.tanh %2 : vector<8x512xf32>
    %c0_3 = arith.constant 0 : index
    %c0_4 = arith.constant 0 : index
    %4 = vector.load %arg2[%c0_3, %c0_4] : memref<8x512xf32, #tpu.memory_space<vmem>>, vector<8x512xf32>
    tpu.vector_store %arg2[%c0_3, %c0_4], %3 {strides = array<i32>} : memref<8x512xf32, #tpu.memory_space<vmem>>, vector<8x512xf32>,
    return
  }
}

</mosaic_0001>

<bundles_post_ra>
// kernel: conv_bn_activation2d.1
= control target key start
LH: loop header
LB: loop body
LE: loop exit
PB: predicated region body
PF: predicated region fallthrough
CT: control target
= control target key end

     0   :  { %v234_v3 = vmov 0.0   ;;  %vm36_vm0 = vcmask 1044480   ;;  %vm32_vm1 = vcmask 302080   ;;  %s325_s0 = inlined_call_operand.vmem [shape: f32[37,512], index: 0, kind: input, shape index: {}]   ;;  %s326_s1 = inlined_call_operand.vmem [shape: f32[8,37], index: 1, kind: input, shape index: {}]   ;;  %s327_s2 = inlined_call_operand.vmem [shape: f32[8,512], index: 2, kind: output, shape index: {}]  }
   0x1   :  { %v13_v0 = vld [vmem:[%s325_s0 + $0x8] sm:$0xff]  ;;  %v15_v2 = vld [vmem:[%s325_s0 + $0x18] sm:$0xff]  ;;  %113 = vmatprep.mubr.f32.mxu0 %v234_v3  ;;  %184 = vmatprep.mubr.f32.mxu1 %v234_v3  ;;  %v12_v6 = vld [vmem:[%s325_s0] sm:$0xff] }
   0x2   :  { %v17_v1 = vld [vmem:[%s325_s0 + $0x28] sm:$0xff]  ;;  %v19_v5 = vld [vmem:[%s325_s0 + $0x38] sm:$0xff]  ;;  %v16_v7 = vld [vmem:[%s325_s0 + $0x20] sm:$0xff] }
   0x3   :  { %v209_v4 = vpack.c.bf16 %v17_v1, %v13_v0  ;;  %v217_v8 = vpack.c.bf16 %v19_v5, %v15_v2  ;;  %v211_v9 = vpack.c.bf16 %v16_v7, %v12_v6  ;;  %v14_v10 = vld [vmem:[%s325_s0 + $0x10] sm:$0xff]  ;;  %v21_v12 = vld [vmem:[%s325_s0 + $0x48] sm:$0xff]  ;;  %v23_v15 = vld [vmem:[%s325_s0 + $0x58] sm:$0xff] }
   0x4   :  { %v18_v11 = vld [vmem:[%s325_s0 + $0x30] sm:$0xff]  ;;  %v25_v14 = vld [vmem:[%s325_s0 + $0x68] sm:$0xff]  ;;  %v27_v16 = vld [vmem:[%s325_s0 + $0x78] sm:$0xff] }
   0x5   :  { %210 = vmatprep.subr.bf16.mxu0 %v209_v4  ;;  %v219_v13 = vpack.c.bf16 %v18_v11, %v14_v10  ;;  %218 = vmatprep.subr.bf16.mxu1 %v217_v8  ;;  %v213_v17 = vpack.c.bf16 %v25_v14, %v21_v12  ;;  %v221_v18 = vpack.c.bf16 %v27_v16, %v23_v15  ;;  %v20_v19 = vld [vmem:[%s325_s0 + $0x40] sm:$0xff]  ;;  %v22_v21 = vld [vmem:[%s325_s0 + $0x50] sm:$0xff]  ;;  %v29_v25 = vld [vmem:[%s325_s0 + $0x88] sm:$0x1f] }
   0x6   :  { %212 = vmatpush1.bf16.msra.mxu0 %v211_v9  ;;  %v24_v20 = vld [vmem:[%s325_s0 + $0x60] sm:$0xff]  ;;  %v26_v23 = vld [vmem:[%s325_s0 + $0x70] sm:$0xff]  ;;  %v31_v26 = vld [vmem:[%s325_s0 + $0x98] sm:$0x1f] }
   0x7   :  { %220 = vmatpush1.bf16.msra.mxu1 %v219_v13  ;;  %v215_v22 = vpack.c.bf16 %v24_v20, %v20_v19  ;;  %214 = vmatprep.subr.bf16.mxu0 %v213_v17  ;;  %v223_v24 = vpack.c.bf16 %v26_v23, %v22_v21  ;;  %v28_v27 = vld [vmem:[%s325_s0 + $0x80] sm:$0x1f]  ;;  %v30_v28 = vld [vmem:[%s325_s0 + $0x90] sm:$0x1f] }
   0x8   :  { %222 = vmatprep.subr.bf16.mxu1 %v221_v18  ;;  %v11_v29 = vld [vmem:[%s326_s1] sm:$0xff] }
   0xa   :  { %216 = vmatpush1.bf16.msra.mxu0 %v215_v22 }
   0xb   :  { %224 = vmatpush1.bf16.msra.mxu1 %v223_v24  ;;  %203 = vmatprep.subr.msk.mxu0 %vm36_vm0, %v29_v25 }
   0xc   :  { %206 = vmatprep.subr.msk.mxu1 %vm36_vm0, %v31_v26 }
   0xe   :  { %204 = vmatpush1.msk.msra.mxu0 %vm36_vm0, %v28_v27 }
   0xf   :  { %207 = vmatpush1.msk.msra.mxu1 %vm36_vm0, %v30_v28  ;;  %205 = vmatmul.mubr.msk.f32.vlgmr.msra.gmra.mrb[0].mxu0 %vm32_vm1, %v11_v29 }
  0x10   :  { %208 = vmatmul.mubr.msk.f32.vlgmr.msra.gmra.mrb[0].mxu1 %vm32_vm1, %v11_v29 }
  0xe2   :  { %v115_v30 = vpop.f32.mrb[0].mxu0 }
  0xe3   :  { %226 = vtanh.f32 %v115_v30  ;;  %v186_v31 = vpop.f32.mrb[0].mxu1  ;;  %v117_v32 = vpop.f32.mrb[1].mxu0 }
  0xe4   :  { %228 = vtanh.f32 %v186_v31  ;;  %v188_v33 = vpop.f32.mrb[1].mxu1 }
  0xe5   :  { %230 = vtanh.f32 %v117_v32 }
  0xe6   :  { %232 = vtanh.f32 %v188_v33 }
  0xed   :  { %v227_v34 = vpop.eup %226 }
  0xee   :  { %v229_v35 = vpop.eup %228  ;;  %195 = vst [vmem:[%s327_s2] sm:$0xff] %v227_v34 }
  0xef   :  { %v231_v36 = vpop.eup %230  ;;  %197 = vst [vmem:[%s327_s2 + $0x10] sm:$0xff] %v229_v35 }
  0xf0   :  { %v233_v37 = vpop.eup %232  ;;  %196 = vst [vmem:[%s327_s2 + $0x8] sm:$0xff] %v231_v36 }
  0xf1   :  { %198 = vst [vmem:[%s327_s2 + $0x18] sm:$0xff] %v233_v37 }

</bundles_post_ra>
